<compile_context>
chip_gen: v6e
topology: v6e:2x2x1
jax: 0.10.0
libtpu: 0.0.40
codegen_flags: <defaults>
</compile_context>

<pallas_src>
import jax
import jax.numpy as jnp
from jax import lax
from jax.experimental import pallas as pl
from jax.experimental.pallas import tpu as pltpu


def _round_up(x: int, m: int) -> int:
    return ((x + m - 1) // m) * m


def _make_router_kernel(top_k: int):
    def kernel(x_ref, w_ref, b_ref, probs_ref, idx_ref):
        x = x_ref[...]                       # (tile_n, D) compute dtype (bf16/f32)
        w = w_ref[...]                       # (D, E)      compute dtype
        b = b_ref[...]                       # (1, E)      f32

        # Linear: logits = x @ W^T + b  (W passed pre-transposed); f32 accumulate.
        logits = jnp.dot(x, w, preferred_element_type=jnp.float32) + b   # (n, E)

        n, e = logits.shape
        expert_ids = lax.broadcasted_iota(jnp.int32, (n, e), 1)
        neg_inf = jnp.float32(-jnp.inf)

        work = logits
        keep = jnp.zeros((n, e), dtype=jnp.bool_)
        idx_cols = []
        m0 = None          # row max from iteration 0 (softmax max)
        denom = None       # sum_k exp(topv_k - topv_0), built incrementally

        # Iterative top-k extraction (largest first, lowest index on ties,
        # matching torch.topk's sorted=True behavior).
        for k in range(top_k):
            m = jnp.max(work, axis=-1, keepdims=True)            # (n, 1) k-th largest
            if k == 0:
                m0 = m
                denom = jnp.ones_like(m)                         # exp(0) = 1
            else:
                denom = denom + jnp.exp(m - m0)
            is_max = work == m
            sel_idx = jnp.min(
                jnp.where(is_max, expert_ids, jnp.int32(e)),
                axis=-1, keepdims=True)                          # (n, 1)
            sel = expert_ids == sel_idx                          # (n, E)
            keep = jnp.logical_or(keep, sel)
            work = jnp.where(sel, neg_inf, work)
            idx_cols.append(sel_idx)

        # Masked softmax without extra lane reductions:
        #   probs = where(keep, exp(logits - m0) / denom, 0)
        # m0 is the row max, so exp(logits - m0) <= 1 everywhere (no overflow).
        inv_denom = pl.reciprocal(denom, approx=True)            # EUP slot
        ex = jnp.exp(logits - m0)
        probs_ref[...] = jnp.where(keep, ex * inv_denom, jnp.float32(0.0))
        idx_ref[...] = jnp.concatenate(idx_cols, axis=-1).astype(jnp.int32)

    return kernel


def topk_router(x, weight, bias, top_k,
                *, compute_dtype=jnp.bfloat16, tile_n=512):
    """x: (B, T, D) f32; weight: (E, D) f32 (torch Linear layout); bias: (E,).

    Returns (router_probs (B, T, E) f32, indices (B, T, top_k) int32).
    """
    B, T, D = x.shape
    E = weight.shape[0]
    assert top_k <= E, "top_k must not exceed the number of experts"
    N = B * T

    # MXU inputs in compute_dtype (bf16 halves HBM traffic of x, the dominant
    # stream); bias and all post-matmul math stay f32.
    x2 = x.reshape(N, D).astype(compute_dtype)
    w_t = weight.T.astype(compute_dtype)                 # (D, E)
    b2 = bias.astype(jnp.float32).reshape(1, E)

    # Token tile: multiple of 8 sublanes; 512 aligns the MXU M dim on all gens.
    tile_n = min(tile_n, _round_up(N, 8))
    grid = (pl.cdiv(N, tile_n),)

    # Explicit VMEM budget (double-buffered inputs/outputs + resident weight),
    # with margin for in-kernel temporaries; capped for v7x's 64 MiB VMEM.
    in_bytes = jnp.dtype(compute_dtype).itemsize
    vmem_budget = (2 * tile_n * D * in_bytes      # x (double-buffered)
                   + 2 * D * E * in_bytes         # w
                   + 2 * E * 4                    # bias
                   + 2 * tile_n * E * 4           # probs
                   + 2 * tile_n * top_k * 4)      # idx
    vmem_limit = int(min(64 << 20, max(8 << 20, 4 * vmem_budget)))

    kernel = _make_router_kernel(top_k)

    grid_spec = pl.GridSpec(
        grid=grid,
        in_specs=[
            pl.BlockSpec((tile_n, D), lambda i: (i, 0)),   # x: tiled over tokens
            pl.BlockSpec((D, E), lambda i: (0, 0)),        # W^T: resident
            pl.BlockSpec((1, E), lambda i: (0, 0)),        # bias: resident
        ],
        out_specs=[
            pl.BlockSpec((tile_n, E), lambda i: (i, 0)),
            pl.BlockSpec((tile_n, top_k), lambda i: (i, 0)),
        ],
    )

    probs, idx = pl.pallas_call(
        kernel,
        grid_spec=grid_spec,
        out_shape=(
            jax.ShapeDtypeStruct((N, E), jnp.float32),
            jax.ShapeDtypeStruct((N, top_k), jnp.int32),
        ),
        compiler_params=pltpu.CompilerParams(
            dimension_semantics=("parallel",),
            vmem_limit_bytes=vmem_limit),
    )(x2, w_t, b2)

    return probs.reshape(B, T, E), idx.reshape(B, T, top_k)


if __name__ == "__main__":
    # Small, module-consistent shapes: batch=2, seq=8, n_embed=32, 8 experts, top_k=2
    B, T, n_embed, num_experts, top_k = 2, 8, 32, 8, 2

    key = jax.random.PRNGKey(0)
    kx, kw, kb = jax.random.split(key, 3)
    x = jax.random.normal(kx, (B, T, n_embed), dtype=jnp.float32)
    # Deterministic Linear params (torch layout: weight (E, D), bias (E,))
    bound = 1.0 / (n_embed ** 0.5)
    weight = jax.random.uniform(kw, (num_experts, n_embed),
                                minval=-bound, maxval=bound, dtype=jnp.float32)
    bias = jax.random.uniform(kb, (num_experts,),
                              minval=-bound, maxval=bound, dtype=jnp.float32)

    probs, idx = topk_router(x, weight, bias, top_k)
    jax.block_until_ready(probs)
    jax.block_until_ready(idx)

    # Lightweight sanity check vs pure-JAX reference using the same bf16
    # matmul inputs as the kernel (f32 accumulation), so indices match exactly.
    logits_ref = (jnp.dot(x.reshape(-1, n_embed).astype(jnp.bfloat16),
                          weight.T.astype(jnp.bfloat16),
                          preferred_element_type=jnp.float32)
                  + bias).reshape(B, T, num_experts)
    topv, topi = jax.lax.top_k(logits_ref, top_k)
    ref = jnp.zeros_like(logits_ref).at[
        jnp.arange(B)[:, None, None], jnp.arange(T)[None, :, None], topi
    ].set(jax.nn.softmax(topv, axis=-1))

    assert jnp.array_equal(idx, topi), "router indices mismatch"
    assert jnp.allclose(probs, ref, atol=2e-3), "router probs mismatch"

    print("KERNEL_OK")
</pallas_src>

<mosaic_0001>
module attributes {stable_mosaic.version = 11 : i64} {
  func.func @kernel(%arg0: i32, %arg1: memref<16x32xbf16, #tpu.memory_space<vmem>>, %arg2: memref<32x8xbf16, #tpu.memory_space<vmem>>, %arg3: memref<1x8xf32, #tpu.memory_space<vmem>>, %arg4: memref<16x8xf32, #tpu.memory_space<vmem>>, %arg5: memref<16x2xi32, #tpu.memory_space<vmem>>) attributes {dimension_semantics = [#tpu.dimension_semantics<parallel>], iteration_bounds = array<i64: 1>, scalar_prefetch = 0 : i64, scratch_operands = 0 : i64, tpu.core_type = #tpu.core_type<tc>, window_params = [{transform_indices = @transform_0, window_bounds = array<i64: 16, 32>}, {pipeline_mode = #tpu.pipeline_mode<synchronous>, transform_indices = @transform_1, window_bounds = array<i64: 32, 8>}, {pipeline_mode = #tpu.pipeline_mode<synchronous>, transform_indices = @transform_2, window_bounds = array<i64: 1, 8>}, {transform_indices = @transform_3, window_bounds = array<i64: 16, 8>}, {transform_indices = @transform_4, window_bounds = array<i64: 16, 2>}]} {
    %c0 = arith.constant 0 : index
    %c0_0 = arith.constant 0 : index
    %0 = vector.load %arg1[%c0, %c0_0] : memref<16x32xbf16, #tpu.memory_space<vmem>>, vector<16x32xbf16>
    %c0_1 = arith.constant 0 : index
    %c0_2 = arith.constant 0 : index
    %1 = vector.load %arg2[%c0_1, %c0_2] : memref<32x8xbf16, #tpu.memory_space<vmem>>, vector<32x8xbf16>
    %c0_3 = arith.constant 0 : index
    %c0_4 = arith.constant 0 : index
    %2 = vector.load %arg3[%c0_3, %c0_4] : memref<1x8xf32, #tpu.memory_space<vmem>>, vector<1x8xf32>
    %cst = arith.constant dense<0.000000e+00> : vector<16x8xf32>
    %3 = tpu.matmul %0, %1, %cst {dimension_numbers = #tpu.dot_dimension_numbers<[1], [0], [0], [1], [0, 0, 1, 1], [], []>} : vector<16x32xbf16>, vector<32x8xbf16>, vector<16x8xf32> -> vector<16x8xf32>
    %4 = vector.broadcast %2 : vector<1x8xf32> to vector<16x8xf32>
    %5 = arith.addf %3, %4 : vector<16x8xf32>
    %6 = tpu.iota {dimensions = array<i32: 1>} : vector<16x8xi32>
    %false = arith.constant false
    %7 = vector.broadcast %false : i1 to vector<16x8xi1>
    %cst_5 = arith.constant dense<0xFF800000> : vector<16xf32>
    %8 = vector.multi_reduction <maximumf>, %5, %cst_5 [1] : vector<16x8xf32> to vector<16xf32>
    %9 = vector.shape_cast %8 : vector<16xf32> to vector<16x1xf32>
    %cst_6 = arith.constant 1.000000e+00 : f32
    %10 = vector.broadcast %cst_6 : f32 to vector<16x1xf32>
    %11 = vector.broadcast %9 : vector<16x1xf32> to vector<16x8xf32>
    %12 = arith.cmpf oeq, %5, %11 : vector<16x8xf32>
    %c8_i32 = arith.constant 8 : i32
    %13 = vector.broadcast %c8_i32 : i32 to vector<16x8xi32>
    %14 = arith.select %12, %6, %13 : vector<16x8xi1>, vector<16x8xi32>
    %cst_7 = arith.constant dense<2147483647> : vector<16xi32>
    %15 = vector.multi_reduction <minsi>, %14, %cst_7 [1] : vector<16x8xi32> to vector<16xi32>
    %16 = vector.shape_cast %15 : vector<16xi32> to vector<16x1xi32>
    %17 = vector.broadcast %16 : vector<16x1xi32> to vector<16x8xi32>
    %18 = arith.cmpi eq, %6, %17 : vector<16x8xi32>
    %19 = arith.ori %7, %18 : vector<16x8xi1>
    %cst_8 = arith.constant 0xFF800000 : f32
    %20 = vector.broadcast %cst_8 : f32 to vector<16x8xf32>
    %21 = arith.select %18, %20, %5 : vector<16x8xi1>, vector<16x8xf32>
    %cst_9 = arith.constant dense<0xFF800000> : vector<16xf32>
    %22 = vector.multi_reduction <maximumf>, %21, %cst_9 [1] : vector<16x8xf32> to vector<16xf32>
    %23 = vector.shape_cast %22 : vector<16xf32> to vector<16x1xf32>
    %24 = arith.subf %23, %9 : vector<16x1xf32>
    %25 = math.exp %24 : vector<16x1xf32>
    %26 = arith.addf %10, %25 : vector<16x1xf32>
    %27 = vector.broadcast %23 : vector<16x1xf32> to vector<16x8xf32>
    %28 = arith.cmpf oeq, %21, %27 : vector<16x8xf32>
    %c8_i32_10 = arith.constant 8 : i32
    %29 = vector.broadcast %c8_i32_10 : i32 to vector<16x8xi32>
    %30 = arith.select %28, %6, %29 : vector<16x8xi1>, vector<16x8xi32>
    %cst_11 = arith.constant dense<2147483647> : vector<16xi32>
    %31 = vector.multi_reduction <minsi>, %30, %cst_11 [1] : vector<16x8xi32> to vector<16xi32>
    %32 = vector.shape_cast %31 : vector<16xi32> to vector<16x1xi32>
    %33 = vector.broadcast %32 : vector<16x1xi32> to vector<16x8xi32>
    %34 = arith.cmpi eq, %6, %33 : vector<16x8xi32>
    %35 = arith.ori %19, %34 : vector<16x8xi1>
    %36 = tpu.reciprocal %26 {approx = true} : vector<16x1xf32> -> vector<16x1xf32>
    %37 = vector.broadcast %9 : vector<16x1xf32> to vector<16x8xf32>
    %38 = arith.subf %5, %37 : vector<16x8xf32>
    %39 = math.exp %38 : vector<16x8xf32>
    %40 = vector.broadcast %36 : vector<16x1xf32> to vector<16x8xf32>
    %41 = arith.mulf %39, %40 : vector<16x8xf32>
    %cst_12 = arith.constant 0.000000e+00 : f32
    %42 = vector.broadcast %cst_12 : f32 to vector<16x8xf32>
    %43 = arith.select %35, %41, %42 : vector<16x8xi1>, vector<16x8xf32>
    %c0_13 = arith.constant 0 : index
    %c0_14 = arith.constant 0 : index
    %44 = vector.load %arg4[%c0_13, %c0_14] : memref<16x8xf32, #tpu.memory_space<vmem>>, vector<16x8xf32>
    tpu.vector_store %arg4[%c0_13, %c0_14], %43 {strides = array<i32>} : memref<16x8xf32, #tpu.memory_space<vmem>>, vector<16x8xf32>,
    %45 = tpu.concatenate %16, %32 in 1 : vector<16x1xi32>, vector<16x1xi32> -> vector<16x2xi32>
    %c0_15 = arith.constant 0 : index
    %c0_16 = arith.constant 0 : index
    %46 = vector.load %arg5[%c0_15, %c0_16] : memref<16x2xi32, #tpu.memory_space<vmem>>, vector<16x2xi32>
    tpu.vector_store %arg5[%c0_15, %c0_16], %45 {strides = array<i32>} : memref<16x2xi32, #tpu.memory_space<vmem>>, vector<16x2xi32>,
    return
  }
  func.func @transform_0(%arg0: i32) -> (i32, i32) {
    %c0_i32 = arith.constant 0 : i32
    %c0_i32_0 = arith.constant 0 : i32
    return %arg0, %c0_i32 : i32, i32
  }
  func.func @transform_1(%arg0: i32) -> (i32, i32) {
    %c0_i32 = arith.constant 0 : i32
    %c0_i32_0 = arith.constant 0 : i32
    %c0_i32_1 = arith.constant 0 : i32
    return %c0_i32, %c0_i32_0 : i32, i32
  }
  func.func @transform_2(%arg0: i32) -> (i32, i32) {
    %c0_i32 = arith.constant 0 : i32
    %c0_i32_0 = arith.constant 0 : i32
    %c0_i32_1 = arith.constant 0 : i32
    return %c0_i32, %c0_i32_0 : i32, i32
  }
  func.func @transform_3(%arg0: i32) -> (i32, i32) {
    %c0_i32 = arith.constant 0 : i32
    %c0_i32_0 = arith.constant 0 : i32
    return %arg0, %c0_i32 : i32, i32
  }
  func.func @transform_4(%arg0: i32) -> (i32, i32) {
    %c0_i32 = arith.constant 0 : i32
    %c0_i32_0 = arith.constant 0 : i32
    return %arg0, %c0_i32 : i32, i32
  }
}

</mosaic_0001>

<bundles_post_ra>
// kernel: tpu_custom_call.1
= control target key start
LH: loop header
LB: loop body
LE: loop exit
PB: predicated region body
PF: predicated region fallthrough
CT: control target
= control target key end

     0   :  { %v252_v0 = vmov 0.0   ;;  %vm253_vm0 = vmmov 0   ;;  %vm47_vm1 = vcmask 261120   ;;  %vm94_vm2 = vcmask 64512   ;;  %s369_s1 = inlined_call_operand.vmem [shape: bf16[32,8], index: 1, kind: input, shape index: {}]   ;;  %s370_s0 = inlined_call_operand.vmem [shape: bf16[16,32], index: 0, kind: input, shape index: {}]   ;;  %s371_s2 = inlined_call_operand.vmem [shape: f32[1,8], index: 2, kind: input, shape index: {}]   ;;  %s372_s4 = inlined_call_operand.vmem [shape: s32[16,2], index: 4, kind: output, shape index: {1}]   ;;  %s373_s3 = inlined_call_operand.vmem [shape: f32[16,8], index: 3, kind: output, shape index: {0}]  }
   0x1   :  { %227 = vmatprep.subr.bf16.mxu0 %v252_v0  ;;  %v237_v1 = vld [vmem:[%s369_s1 + $0x8] sm:$0xff]   ;;  %231 = vmatprep.mubr.msk.bf16.mxu0 %vm253_vm0, %v252_v0  ;;  %v238_v2 = vld [vmem:[%s369_s1] sm:$0xff]   ;;  %v92_v13 = vlaneseq  ;;  %vm205_vm13 = vcmask 7168   ;;  %vm208_vm14 = vcmask 15360  }
   0x2   :  { %228 = vmatpush3.bf16.msra.mxu0 %v237_v1  ;;  %v239_v3 = vld [vmem:[%s370_s0] sm:$0xff]  }
   0x3   :  { %229 = vmatprep.subr.bf16.mxu0 %v252_v0  ;;  %v219_v4 = vld [vmem:[%s371_s2] ss:$0 sm:$0xff]  ;;  %v299_v14 = vand.u32 127, %v92_v13 }
   0x6   :  { %230 = vmatpush3.bf16.msra.mxu0 %v238_v2 }
   0x9   :  { %232 = vmatmul.mubr.msk.bf16.vlgmr.msra.gmra.mxu0 %vm47_vm1, %v239_v3 }
  0xc9   :  { %v85_v5 = vpop.f32.mrf.mxu0 }
  0xca   :  { %v291_v6 = vadd.f32 %v219_v4, %v85_v5 }
  0xcb   :  { %v233_v7 = vpop.f32.mrf.mxu0 }
  0xcc   :  { %v95_v8 = vsel %vm94_vm2, %v291_v6, -inf }
  0xcd   :  { %96 = vmax.xlane.f32.xlu0 %v95_v8  ;;  %v88_v9 = vpop.f32.mrf.mxu0 }
  0xce   :  { %v295_v10 = vadd.f32 %v219_v4, %v88_v9 }
  0xcf   :  { %v234_v11 = vpop.f32.mrf.mxu0 }
  0xd0   :  { %v98_v12 = vsel %vm94_vm2, %v295_v10, -inf }
  0xd1   :  { %99 = vmax.xlane.f32.xlu0 %v98_v12 }
 0x156   :  { %v301_v15 = vpop.xlane.xlu0 %96 }
 0x157   :  { %vm101_vm3 = vcmp.eq.f32.partialorder %v291_v6, %v301_v15  ;;  %v193_v7 = vsub.f32 %v291_v6, %v301_v15 }
 0x158   :  { %v103_v16 = vsel %vm101_vm3, %v299_v14, 8 }
 0x159   :  { %v105_v17 = vsel %vm94_vm2, %v103_v16, 2147483647  ;;  %v195_v11 = vmul.f32 1.442695, %v193_v7 }
 0x15a   :  { %v307_v18 = vpop.xlane.xlu0 %99  ;;  %v107_v19 = vshra.s32 %v105_v17, 16  ;;  %v106_v25 = vand.u32 65535, %v105_v17 }
 0x15b   :  { %vm102_vm4 = vcmp.eq.f32.partialorder %v295_v10, %v307_v18  ;;  %v194_v12 = vsub.f32 %v295_v10, %v307_v18 }
 0x15c   :  { %v109_v20 = vcvt.s32.f32 %v107_v19  ;;  %v104_v21 = vsel %vm102_vm4, %v299_v14, 8  ;;  %v108_v27 = vcvt.s32.f32 %v106_v25 }
 0x15d   :  { %v120_v22 = vsel %vm94_vm2, %v104_v21, 2147483647  ;;  %v197_v16 = vmul.f32 1.442695, %v194_v12 }
 0x15e   :  { %110 = vmin.xlane.f32.xlu1 %v109_v20  ;;  %v122_v23 = vshra.s32 %v120_v22, 16  ;;  %v121_v28 = vand.u32 65535, %v120_v22 }
 0x160   :  { %v124_v24 = vcvt.s32.f32 %v122_v23  ;;  %v123_v31 = vcvt.s32.f32 %v121_v28 }
 0x162   :  { %125 = vmin.xlane.f32.xlu1 %v124_v24 }
 0x1e7   :  { %v111_v26 = vpop.xlane.xlu1 %110 }
 0x1e8   :  { %vm112_vm5 = vcmp.eq.f32.partialorder %v109_v20, %v111_v26  ;;  %v117_v33 = vcvt.f32.s32 %v111_v26 }
 0x1e9   :  { %v113_v29 = vsel %vm112_vm5, %v108_v27, inf }
 0x1ea   :  { %114 = vmin.xlane.f32.xlu0 %v113_v29  ;;  %v118_v35 = vshll.u32 %v117_v33, 16 }
 0x1eb   :  { %v126_v30 = vpop.xlane.xlu1 %125 }
 0x1ec   :  { %vm127_vm6 = vcmp.eq.f32.partialorder %v124_v24, %v126_v30  ;;  %v132_v36 = vcvt.f32.s32 %v126_v30 }
 0x1ed   :  { %v128_v32 = vsel %vm127_vm6, %v123_v31, inf }
 0x1ee   :  { %129 = vmin.xlane.f32.xlu1 %v128_v32  ;;  %v133_v40 = vshll.u32 %v132_v36, 16 }
 0x273   :  { %v115_v34 = vpop.xlane.xlu0 %114 }
 0x274   :  { %v116_v37 = vcvt.f32.s32 %v115_v34 }
 0x276   :  { %v313_v38 = vadd.s32 %v118_v35, %v116_v37 }
 0x277   :  { %v130_v39 = vpop.xlane.xlu1 %129 }
 0x278   :  { %v131_v41 = vcvt.f32.s32 %v130_v39  ;;  %vm135_vm7 = vcmp.eq.s32.totalorder %v299_v14, %v313_v38 }
 0x279   :  { %v137_v42 = vsel %vm135_vm7, -inf, %v291_v6 }
 0x27a   :  { %v321_v43 = vadd.s32 %v133_v40, %v131_v41  ;;  %v139_v44 = vsel %vm94_vm2, %v137_v42, -inf }
 0x27b   :  { %140 = vmax.xlane.f32.xlu0 %v139_v44 }
 0x27c   :  { %vm136_vm8 = vcmp.eq.s32.totalorder %v299_v14, %v321_v43 }
 0x27d   :  { %v138_v45 = vsel %vm136_vm8, -inf, %v295_v10 }
 0x27e   :  { %v142_v46 = vsel %vm94_vm2, %v138_v45, -inf }
 0x27f   :  { %143 = vmax.xlane.f32.xlu1 %v142_v46 }
 0x304   :  { %v141_v47 = vpop.xlane.xlu0 %140 }
 0x305   :  { %vm153_vm9 = vcmp.eq.f32.partialorder %v137_v42, %v141_v47  ;;  %v145_v1 = vsub.f32 %v141_v47, %v301_v15 }
 0x306   :  { %v155_v48 = vsel %vm153_vm9, %v299_v14, 8 }
 0x307   :  { %v157_v49 = vsel %vm94_vm2, %v155_v48, 2147483647  ;;  %v147_v2 = vmul.f32 1.442695, %v145_v1 }
 0x308   :  { %v144_v50 = vpop.xlane.xlu1 %143  ;;  %v159_v51 = vshra.s32 %v157_v49, 16  ;;  %v158_v57 = vand.u32 65535, %v157_v49 }
 0x309   :  { %vm154_vm10 = vcmp.eq.f32.partialorder %v138_v45, %v144_v50  ;;  %v146_v3 = vsub.f32 %v144_v50, %v307_v18  ;;  %240 = vpow2.f32 %v147_v2 }
 0x30a   :  { %v156_v52 = vsel %vm154_vm10, %v299_v14, 8  ;;  %v161_v53 = vcvt.s32.f32 %v159_v51  ;;  %v160_v59 = vcvt.s32.f32 %v158_v57 }
 0x30b   :  { %v172_v54 = vsel %vm94_vm2, %v156_v52, 2147483647  ;;  %v149_v4 = vmul.f32 1.442695, %v146_v3 }
 0x30c   :  { %162 = vmin.xlane.f32.xlu0 %v161_v53  ;;  %v174_v55 = vshra.s32 %v172_v54, 16  ;;  %v173_v60 = vand.u32 65535, %v172_v54 }
 0x30d   :  { %242 = vpow2.f32 %v149_v4 }
 0x30e   :  { %v176_v56 = vcvt.s32.f32 %v174_v55  ;;  %v175_v63 = vcvt.s32.f32 %v173_v60 }
 0x310   :  { %177 = vmin.xlane.f32.xlu1 %v176_v56 }
 0x316   :  { %v241_v5 = vpop.eup %240 }
 0x317   :  { %v151_v8 = vadd.f32 1.0, %v241_v5 }
 0x319   :  { %244 = vrcp.f32 %v151_v8 }
 0x31a   :  { %v243_v9 = vpop.eup %242  ;;  %246 = vpow2.f32 %v195_v11 }
 0x31b   :  { %v152_v13 = vadd.f32 1.0, %v243_v9 }
 0x31d   :  { %248 = vrcp.f32 %v152_v13 }
 0x31e   :  { %250 = vpow2.f32 %v197_v16 }
 0x326   :  { %v245_v20 = vpop.eup %244 }
 0x327   :  { %v247_v6 = vpop.eup %246 }
 0x328   :  { %v199_v24 = vmul.f32 %v247_v6, %v245_v20 }
 0x32a   :  { %v249_v27 = vpop.eup %248 }
 0x32b   :  { %v251_v30 = vpop.eup %250 }
 0x32c   :  { %v200_v31 = vmul.f32 %v251_v30, %v249_v27 }
 0x395   :  { %v163_v58 = vpop.xlane.xlu0 %162 }
 0x396   :  { %vm164_vm11 = vcmp.eq.f32.partialorder %v161_v53, %v163_v58  ;;  %v169_v17 = vcvt.f32.s32 %v163_v58 }
 0x397   :  { %v165_v61 = vsel %vm164_vm11, %v160_v59, inf }
 0x398   :  { %166 = vmin.xlane.f32.xlu0 %v165_v61  ;;  %v170_v21 = vshll.u32 %v169_v17, 16 }
 0x399   :  { %v178_v62 = vpop.xlane.xlu1 %177 }
 0x39a   :  { %vm179_vm12 = vcmp.eq.f32.partialorder %v176_v56, %v178_v62  ;;  %v184_v22 = vcvt.f32.s32 %v178_v62 }
 0x39b   :  { %v180_v0 = vsel %vm179_vm12, %v175_v63, inf }
 0x39c   :  { %181 = vmin.xlane.f32.xlu1 %v180_v0  ;;  %v185_v26 = vshll.u32 %v184_v22, 16 }
 0x421   :  { %v167_v19 = vpop.xlane.xlu0 %166 }
 0x422   :  { %v168_v23 = vcvt.f32.s32 %v167_v19 }
 0x424   :  { %v171_v15 = vadd.s32 %v170_v21, %v168_v23 }
 0x425   :  { %v182_v25 = vpop.xlane.xlu1 %181 }
 0x426   :  { %vm187_vm15 = vcmp.eq.s32.totalorder %v299_v14, %v171_v15  ;;  %v206_v10 = vsel %vm205_vm13, %v313_v38, %v171_v15  ;;  %v183_v18 = vcvt.f32.s32 %v182_v25 }
 0x427   :  { %vm189_vm0 = vmor %vm135_vm7, %vm187_vm15  ;;  %209 = vst.msk [vmem:[%s372_s4] sm:$0xff] %vm208_vm14, %v206_v10 }
 0x428   :  { %v201_v28 = vsel %vm189_vm0, %v199_v24, 0.0  ;;  %v186_v29 = vadd.s32 %v185_v26, %v183_v18 }
 0x429   :  { %203 = vst.msk [vmem:[%s373_s3] sm:$0xff] %vm94_vm2, %v201_v28 }
 0x42a   :  { %vm188_vm1 = vcmp.eq.s32.totalorder %v299_v14, %v186_v29  ;;  %v207_v32 = vsel %vm205_vm13, %v321_v43, %v186_v29 }
 0x42b   :  { %vm190_vm3 = vmor %vm136_vm8, %vm188_vm1  ;;  %210 = vst.msk [vmem:[%s372_s4 + $0x8] sm:$0xff] %vm208_vm14, %v207_v32 }
 0x42c   :  { %v202_v33 = vsel %vm190_vm3, %v200_v31, 0.0 }
 0x42d   :  { %204 = vst.msk [vmem:[%s373_s3 + $0x8] sm:$0xff] %vm94_vm2, %v202_v33 }

</bundles_post_ra>
